<compile_context>
chip_gen: v7x
topology: tpu7x:2x2x1
jax: 0.10.0
libtpu: 0.0.40
codegen_flags: <defaults>
</compile_context>

<pallas_src>
import functools

import jax
import jax.numpy as jnp
from jax.experimental import pallas as pl
from jax.experimental.pallas import tpu as pltpu

SUBLANE = 8  # vreg sublane width (second-to-last dim granularity)


def _round_up(n, m):
    return ((n + m - 1) // m) * m


def qnet_kernel(x_ref, w1_ref, b1_ref, w2_ref, b2_ref, o_ref):
    # Hidden layer on the MXU with f32 accumulation; epilogue (bias + ReLU) in f32.
    h = jnp.dot(x_ref[...], w1_ref[...], preferred_element_type=jnp.float32)
    h = jnp.maximum(h + b1_ref[...], 0.0)          # b1 is (1, hid) -> broadcasts
    # Output layer: cast h to the streaming dtype for the MXU, accumulate in f32.
    o = jnp.dot(h.astype(w2_ref.dtype), w2_ref[...],
                preferred_element_type=jnp.float32)
    o_ref[...] = (o + b2_ref[...]).astype(o_ref.dtype)


def prepare_params(w1, b1, w2, b2, *, compute_dtype=jnp.float32):
    """Cast parameters ONCE (at module construction), not per forward call.

    compute_dtype is the dtype streamed through the MXU (f32 or bf16; bf16
    halves the streamed HBM bytes on every generation, biggest win on v5e).
    Biases stay f32 because the epilogue runs in f32 on every chip.
    """
    return (w1.astype(compute_dtype),
            b1.reshape(1, -1).astype(jnp.float32),
            w2.astype(compute_dtype),
            b2.reshape(1, -1).astype(jnp.float32))


@functools.partial(jax.jit, static_argnames=("block_m", "core_parallel"))
def linear_qnet_forward(x, w1, b1, w2, b2, *, block_m=2048, core_parallel=False):
    """Two-layer MLP forward.

    x : (B, in)      w1 : (in, hid)   b1 : (1, hid)
    w2 : (hid, out)  b2 : (1, out)    (w1/w2 pre-cast via prepare_params)

    block_m       : max batch rows per grid step.  Per-step footprint is tiny
                    (~100 KB at 2048 rows), so 2048-8192 is fine on all chips.
    core_parallel : set True on v7x so the batch grid shards across both
                    TensorCores (needs an even, balanced step count to win 2x).
    """
    batch, in_size = x.shape
    hid = w1.shape[1]
    out_size = w2.shape[1]
    compute_dtype = w1.dtype

    # Derive the tile from the step count so batch padding is bounded by 8 rows
    # (not a full tile), then pad rows so every grid step is a full block.
    n_steps = max(1, pl.cdiv(batch, block_m))
    tm = _round_up(pl.cdiv(batch, n_steps), SUBLANE)
    b_pad = _round_up(batch, tm)

    xp = x.astype(compute_dtype)
    if b_pad != batch:
        xp = jnp.zeros((b_pad, in_size), compute_dtype).at[:batch].set(xp)

    grid = (b_pad // tm,)
    itemsize = jnp.dtype(compute_dtype).itemsize
    cost = pl.CostEstimate(
        flops=2 * b_pad * (in_size * hid + hid * out_size),
        transcendentals=0,
        bytes_accessed=(b_pad * in_size * itemsize                     # streamed x
                        + (in_size * hid + hid * out_size) * itemsize  # weights
                        + (hid + out_size) * 4                         # biases
                        + b_pad * out_size * 4),                       # streamed out
    )
    sem = (pltpu.CORE_PARALLEL,) if core_parallel else ("parallel",)

    # TODO(synk): if an xprof trace ever shows exposed input DMA at very large
    # batches, bump the x BlockSpec to pipeline_mode=pl.Buffered(3).
    out_padded = pl.pallas_call(
        qnet_kernel,
        out_shape=jax.ShapeDtypeStruct((b_pad, out_size), jnp.float32),
        grid=grid,
        in_specs=[
            pl.BlockSpec((tm, in_size), lambda i: (i, 0)),       # x tile streams
            pl.BlockSpec((in_size, hid), lambda i: (0, 0)),      # W1 resident
            pl.BlockSpec((1, hid), lambda i: (0, 0)),            # b1 resident
            pl.BlockSpec((hid, out_size), lambda i: (0, 0)),     # W2 resident
            pl.BlockSpec((1, out_size), lambda i: (0, 0)),       # b2 resident
        ],
        out_specs=pl.BlockSpec((tm, out_size), lambda i: (i, 0)),
        compiler_params=pltpu.CompilerParams(dimension_semantics=sem),
        cost_estimate=cost,
    )(xp, w1, b1, w2, b2)

    return out_padded[:batch]


def init_params(key, input_size, hidden_size, output_size):
    """Deterministic init mirroring nn.Linear's U(-1/sqrt(fan_in), 1/sqrt(fan_in))."""
    k1, k2, k3, k4 = jax.random.split(key, 4)
    lim1 = 1.0 / jnp.sqrt(jnp.float32(input_size))
    lim2 = 1.0 / jnp.sqrt(jnp.float32(hidden_size))
    w1 = jax.random.uniform(k1, (input_size, hidden_size), jnp.float32, -lim1, lim1)
    b1 = jax.random.uniform(k2, (1, hidden_size), jnp.float32, -lim1, lim1)
    w2 = jax.random.uniform(k3, (hidden_size, output_size), jnp.float32, -lim2, lim2)
    b2 = jax.random.uniform(k4, (1, output_size), jnp.float32, -lim2, lim2)
    return w1, b1, w2, b2


# TODO(synk): save()/load() (torch.save / torch.load of the state dict) are host-side
# file I/O, not kernel ops; use e.g. orbax / np.savez on (w1, b1, w2, b2) instead.

if __name__ == "__main__":
    # Typical snake-AI Linear_QNet sizes: input=11, hidden=32, output=3.
    batch, input_size, hidden_size, output_size = 8, 11, 32, 3

    key = jax.random.PRNGKey(0)
    kx, kp, kb = jax.random.split(key, 3)
    x = jax.random.normal(kx, (batch, input_size), jnp.float32)
    w1, b1, w2, b2 = init_params(kp, input_size, hidden_size, output_size)
    ref_fn = lambda a: jnp.maximum(a @ w1 + b1, 0.0) @ w2 + b2

    # Parameters are prepared ONCE (hoisted out of the per-call path).
    params_f32 = prepare_params(w1, b1, w2, b2, compute_dtype=jnp.float32)

    # --- small-batch f32 path (single grid step) ---
    out = linear_qnet_forward(x, *params_f32)
    jax.block_until_ready(out)
    assert out.shape == (batch, output_size)
    assert jnp.allclose(out, ref_fn(x), atol=1e-4, rtol=1e-4)

    # --- larger batch, not a multiple of the tile (multi-step grid path) ---
    big_b = 300
    xb = jax.random.normal(kb, (big_b, input_size), jnp.float32)
    out_big = linear_qnet_forward(xb, *params_f32, block_m=128)
    jax.block_until_ready(out_big)
    ref_big = ref_fn(xb)
    assert out_big.shape == (big_b, output_size)
    assert jnp.allclose(out_big, ref_big, atol=1e-4, rtol=1e-4)

    # --- bf16 streaming path (worthwhile on v5e/v6e/v7x), f32 accum/epilogue ---
    params_bf16 = prepare_params(w1, b1, w2, b2, compute_dtype=jnp.bfloat16)
    out_bf16 = linear_qnet_forward(xb, *params_bf16, block_m=128)
    jax.block_until_ready(out_bf16)
    assert out_bf16.shape == (big_b, output_size)
    assert jnp.allclose(out_bf16, ref_big, atol=1.5e-1, rtol=1e-1)

    print("KERNEL_OK")
</pallas_src>

<mosaic_0001>
module attributes {stable_mosaic.version = 11 : i64} {
  func.func @qnet_kernel(%arg0: i32, %arg1: memref<8x11xf32, #tpu.memory_space<vmem>>, %arg2: memref<11x32xf32, #tpu.memory_space<vmem>>, %arg3: memref<1x32xf32, #tpu.memory_space<vmem>>, %arg4: memref<32x3xf32, #tpu.memory_space<vmem>>, %arg5: memref<1x3xf32, #tpu.memory_space<vmem>>, %arg6: memref<8x3xf32, #tpu.memory_space<vmem>>) attributes {dimension_semantics = [#tpu.dimension_semantics<parallel>], iteration_bounds = array<i64: 1>, scalar_prefetch = 0 : i64, scratch_operands = 0 : i64, tpu.core_type = #tpu.core_type<tc>, window_params = [{transform_indices = @transform_0, window_bounds = array<i64: 8, 11>}, {pipeline_mode = #tpu.pipeline_mode<synchronous>, transform_indices = @transform_1, window_bounds = array<i64: 11, 32>}, {pipeline_mode = #tpu.pipeline_mode<synchronous>, transform_indices = @transform_2, window_bounds = array<i64: 1, 32>}, {pipeline_mode = #tpu.pipeline_mode<synchronous>, transform_indices = @transform_3, window_bounds = array<i64: 32, 3>}, {pipeline_mode = #tpu.pipeline_mode<synchronous>, transform_indices = @transform_4, window_bounds = array<i64: 1, 3>}, {transform_indices = @transform_5, window_bounds = array<i64: 8, 3>}]} {
    %c0 = arith.constant 0 : index
    %c0_0 = arith.constant 0 : index
    %0 = vector.load %arg1[%c0, %c0_0] : memref<8x11xf32, #tpu.memory_space<vmem>>, vector<8x11xf32>
    %c0_1 = arith.constant 0 : index
    %c0_2 = arith.constant 0 : index
    %1 = vector.load %arg2[%c0_1, %c0_2] : memref<11x32xf32, #tpu.memory_space<vmem>>, vector<11x32xf32>
    %cst = arith.constant dense<0.000000e+00> : vector<8x32xf32>
    %2 = tpu.matmul %0, %1, %cst {dimension_numbers = #tpu.dot_dimension_numbers<[1], [0], [0], [1], [0, 0, 1, 1], [], []>} : vector<8x11xf32>, vector<11x32xf32>, vector<8x32xf32> -> vector<8x32xf32>
    %c0_3 = arith.constant 0 : index
    %c0_4 = arith.constant 0 : index
    %3 = vector.load %arg3[%c0_3, %c0_4] : memref<1x32xf32, #tpu.memory_space<vmem>>, vector<1x32xf32>
    %4 = vector.broadcast %3 : vector<1x32xf32> to vector<8x32xf32>
    %5 = arith.addf %2, %4 : vector<8x32xf32>
    %cst_5 = arith.constant 0.000000e+00 : f32
    %6 = vector.broadcast %cst_5 : f32 to vector<8x32xf32>
    %7 = arith.maximumf %5, %6 : vector<8x32xf32>
    %c0_6 = arith.constant 0 : index
    %c0_7 = arith.constant 0 : index
    %8 = vector.load %arg4[%c0_6, %c0_7] : memref<32x3xf32, #tpu.memory_space<vmem>>, vector<32x3xf32>
    %cst_8 = arith.constant dense<0.000000e+00> : vector<8x3xf32>
    %9 = tpu.matmul %7, %8, %cst_8 {dimension_numbers = #tpu.dot_dimension_numbers<[1], [0], [0], [1], [0, 0, 1, 1], [], []>} : vector<8x32xf32>, vector<32x3xf32>, vector<8x3xf32> -> vector<8x3xf32>
    %c0_9 = arith.constant 0 : index
    %c0_10 = arith.constant 0 : index
    %10 = vector.load %arg5[%c0_9, %c0_10] : memref<1x3xf32, #tpu.memory_space<vmem>>, vector<1x3xf32>
    %11 = vector.broadcast %10 : vector<1x3xf32> to vector<8x3xf32>
    %12 = arith.addf %9, %11 : vector<8x3xf32>
    %c0_11 = arith.constant 0 : index
    %c0_12 = arith.constant 0 : index
    %13 = vector.load %arg6[%c0_11, %c0_12] : memref<8x3xf32, #tpu.memory_space<vmem>>, vector<8x3xf32>
    tpu.vector_store %arg6[%c0_11, %c0_12], %12 {strides = array<i32>} : memref<8x3xf32, #tpu.memory_space<vmem>>, vector<8x3xf32>,
    return
  }
  func.func @transform_0(%arg0: i32) -> (i32, i32) {
    %c0_i32 = arith.constant 0 : i32
    %c0_i32_0 = arith.constant 0 : i32
    return %arg0, %c0_i32 : i32, i32
  }
  func.func @transform_1(%arg0: i32) -> (i32, i32) {
    %c0_i32 = arith.constant 0 : i32
    %c0_i32_0 = arith.constant 0 : i32
    %c0_i32_1 = arith.constant 0 : i32
    return %c0_i32, %c0_i32_0 : i32, i32
  }
  func.func @transform_2(%arg0: i32) -> (i32, i32) {
    %c0_i32 = arith.constant 0 : i32
    %c0_i32_0 = arith.constant 0 : i32
    %c0_i32_1 = arith.constant 0 : i32
    return %c0_i32, %c0_i32_0 : i32, i32
  }
  func.func @transform_3(%arg0: i32) -> (i32, i32) {
    %c0_i32 = arith.constant 0 : i32
    %c0_i32_0 = arith.constant 0 : i32
    %c0_i32_1 = arith.constant 0 : i32
    return %c0_i32, %c0_i32_0 : i32, i32
  }
  func.func @transform_4(%arg0: i32) -> (i32, i32) {
    %c0_i32 = arith.constant 0 : i32
    %c0_i32_0 = arith.constant 0 : i32
    %c0_i32_1 = arith.constant 0 : i32
    return %c0_i32, %c0_i32_0 : i32, i32
  }
  func.func @transform_5(%arg0: i32) -> (i32, i32) {
    %c0_i32 = arith.constant 0 : i32
    %c0_i32_0 = arith.constant 0 : i32
    return %arg0, %c0_i32 : i32, i32
  }
}

</mosaic_0001>

<bundles_post_ra>
// kernel: linear_qnet_forward.1
= control target key start
LH: loop header
LB: loop body
LE: loop exit
PB: predicated region body
PF: predicated region fallthrough
CT: control target
= control target key end

     0   :  { %vm34_vm0 = vcmask 1042432   ;;  %v245_v0 = vmov 0.0|0.0   ;;  %vm246_vm1 = vmmov 1   ;;  %vm247_vm3 = vmmov 0   ;;  %s309_s1 = inlined_call_operand.vmem [shape: f32[11,32], index: 1, kind: input, shape index: {}]   ;;  %s310_s3 = inlined_call_operand.vmem [shape: f32[32,3], index: 3, kind: input, shape index: {}]   ;;  %s311_s0 = inlined_call_operand.vmem [shape: f32[8,11], index: 0, kind: input, shape index: {}]   ;;  %s312_s2 = inlined_call_operand.vmem [shape: f32[1,32], index: 2, kind: input, shape index: {}]   ;;  %s313_s4 = inlined_call_operand.vmem [shape: f32[1,3], index: 4, kind: input, shape index: {}]   ;;  %s314_s5 = inlined_call_operand.vmem [shape: f32[8,3], index: 5, kind: output, shape index: {}]  }
   0x1   :  { %231 = vmatprep.subr.bf16.mxu0 %v245_v0  ;;  %v21_v1 = vld [vmem:[%s309_s1] sm:$0xff]  ;;  %v22_v2 = vld [vmem:[%s309_s1 + $0x8] sm:$0x7]  ;;  %vm233_vm2 = vmpackc.low %vm34_vm0, %vm246_vm1  ;;  %235 = vmatprep.subr.bf16.mxu1 %v245_v0  ;;  %v248_v4 = vmov 0.0   ;;  %vm30_vm4 = vcmask 89088   ;;  %vm120_vm5 = vcmask 261120  }
   0x2   :  { %v232_v3 = vpack.c.bf16 %v22_v2, %v21_v1  ;;  %217 = vmatprep.mubr.msk.f32.mxu0 %vm247_vm3, %v248_v4  ;;  %v109_v5 = vld [vmem:[%s310_s3] sm:$0xff]  ;;  %v110_v6 = vld [vmem:[%s310_s3 + $0x8] sm:$0xff]  ;;  %228 = vmatprep.mubr.msk.f32.mxu1 %vm247_vm3, %v248_v4  ;;  %v111_v9 = vld [vmem:[%s310_s3 + $0x10] sm:$0xff]  ;;  %vm194_vm6 = vcmask 23552  }
   0x3   :  { %v236_v7 = vpack.c.bf16 %v110_v6, %v109_v5  ;;  %v20_v8 = vld [vmem:[%s311_s0] sm:$0xff]  ;;  %v112_v10 = vld [vmem:[%s310_s3 + $0x18] sm:$0xff] }
   0x4   :  { %234 = vmatpush3.bf16.msk.msra.mxu0 %vm233_vm2, %v232_v3  ;;  %v239_v11 = vpack.c.bf16 %v112_v10, %v111_v9  ;;  %v200_v12 = vld [vmem:[%s312_s2] ss:$0 sm:$0xff] }
   0x5   :  { %237 = vmatpush3.bf16.msra.mxu1 %v236_v7  ;;  %v203_v17 = vld [vmem:[%s313_s4] ss:$0 sm:$0xff] }
   0x6   :  { %238 = vmatprep.subr.bf16.mxu1 %v245_v0 }
   0x7   :  { %218 = vmatmul.mubr.msk.f32.vlgmr.msra.gmra.mrb[0].mxu0 %vm30_vm4, %v20_v8 }
   0x9   :  { %240 = vmatpush3.bf16.msra.mxu1 %v239_v11 }
  0xda   :  { %v104_v13 = vpop.f32.mrb[0].mxu0 }
  0xdb   :  { %v105_v14 = vadd.f32 %v200_v12, %v104_v13  ;;  %v219_v15 = vpop.f32.mrb[1].mxu0 }
  0xdd   :  { %v108_v16 = vmax.f32 %v105_v14, 0.0 }
  0xdf   :  { %229 = vmatmul.mubr.msk.f32.vlgmr.msra.gmra.mrb[0].mxu1 %vm120_vm5, %v108_v16 }
 0x1b2   :  { %v190_v18 = vpop.f32.mrb[0].mxu1 }
 0x1b3   :  { %v191_v19 = vadd.f32 %v203_v17, %v190_v18  ;;  %v230_v20 = vpop.f32.mrb[1].mxu1 }
 0x1b5   :  { %195 = vst.msk [vmem:[%s314_s5] sm:$0xff] %vm194_vm6, %v191_v19 }

</bundles_post_ra>
